<compile_context>
chip_gen: v6e
topology: v6e:2x2x1
jax: 0.10.0
libtpu: 0.0.40
codegen_flags: <defaults>
</compile_context>

<pallas_src>
import functools

import jax
import jax.numpy as jnp
from jax.experimental import pallas as pl
from jax.experimental.pallas import tpu as pltpu


def _round_up(x, m):
    return (x + m - 1) // m * m


# ----------------------------------------------------------------------------
# Kernel 1: fused encode — softmax(weight)-mix of task_reprs, pooler, L2 norm
#   task layout: (T, B, H) bf16 (lane/sublane-dense tiles, T unrolled VPU adds)
#   grid: batch tiles ("parallel")
# ----------------------------------------------------------------------------
def encode_kernel(w_ref, task_ref, pw_ref, pb_ref, out_ref):
    # w_ref:    (1, T) f32 in SMEM (already softmax-ed)
    # task_ref: (T, tile_b, H) bf16   pw_ref: (H, D) bf16   pb_ref: (1, D) f32
    T = task_ref.shape[0]
    # Task mix: T cheap VPU adds.  Convert on load, accumulate in f32
    # (v5e has no bf16 VALU; on v6e/v7x this stage is memory-bound anyway).
    acc = w_ref[0, 0] * task_ref[0].astype(jnp.float32)
    for t in range(1, T):                          # T is small & static
        acc = acc + w_ref[0, t] * task_ref[t].astype(jnp.float32)
    # pooler: Linear(H -> D), bf16 operands, f32 accumulation on the MXU
    pooled = jnp.dot(acc.astype(jnp.bfloat16), pw_ref[...],
                     preferred_element_type=jnp.float32) + pb_ref[...]
    # F.normalize(dim=-1): x / max(||x||, 1e-12) == x * rsqrt(max(||x||^2, 1e-24))
    sumsq = jnp.sum(pooled * pooled, axis=-1, keepdims=True)
    inv = jax.lax.rsqrt(jnp.maximum(sumsq, 1e-24))
    out_ref[...] = (pooled * inv).astype(out_ref.dtype)


def _pick_encode_tile_b(B, T, H, D, max_tile_b, budget_bytes):
    """Largest batch tile (multiple of 16) whose double-buffered working set
    fits the VMEM budget, capped so the parallel grid axis has >= 2 tiles."""
    granule = 16                                             # bf16 sublane packing
    per_row = 2 * T * H * 2 + 2 * D * 2 + 4 * (H + D)        # task+out bufs, f32 temps
    fixed = 2 * (H * D * 2) + 2 * D * 4 + (2 << 20)          # resident pooler W/b + slack
    tb = max(granule, (budget_bytes - fixed) // max(per_row, 1))
    tb = min(tb, max_tile_b)
    tb = min(tb, _round_up(pl.cdiv(B, 2), granule))          # >= 2 tiles (v7x megacore)
    tb = max(granule, (int(tb) // granule) * granule)
    return tb


def encode(task_tbh, w_soft, pool_w_bf16, pool_b_f32, *, tile_b=None,
           vmem_limit_bytes=48 * 1024 * 1024):
    """task_tbh: (T, B, H) bf16.  Returns (B, D) bf16 L2-normalized reps."""
    T, B, H = task_tbh.shape
    D = pool_w_bf16.shape[1]
    max_tb = 256 if tile_b is None else int(tile_b)          # v6e/v5e may pass 512
    tile_b = _pick_encode_tile_b(B, T, H, D, max_tb, vmem_limit_bytes)
    B_pad = _round_up(B, tile_b)
    if B_pad != B:
        task_tbh = jnp.pad(task_tbh, ((0, 0), (0, B_pad - B), (0, 0)))

    reps = pl.pallas_call(
        encode_kernel,
        out_shape=jax.ShapeDtypeStruct((B_pad, D), jnp.bfloat16),
        grid=(B_pad // tile_b,),
        in_specs=[
            pl.BlockSpec(memory_space=pltpu.MemorySpace.SMEM),   # softmax(weight)
            pl.BlockSpec((T, tile_b, H), lambda i: (0, i, 0)),   # bf16 task slab (tiled B)
            # TODO(synk): pipeline_mode=pl.Buffered(1) would single-buffer this
            # resident pooler weight and reclaim H*D*2 bytes on v7x.
            pl.BlockSpec((H, D), lambda i: (0, 0)),              # pooler W (resident)
            pl.BlockSpec((1, D), lambda i: (0, 0)),              # pooler b (resident)
        ],
        out_specs=pl.BlockSpec((tile_b, D), lambda i: (i, 0)),
        compiler_params=pltpu.CompilerParams(
            dimension_semantics=("parallel",),
            vmem_limit_bytes=vmem_limit_bytes),
    )(w_soft, task_tbh, pool_w_bf16, pool_b_f32)
    return reps[:B]


# ----------------------------------------------------------------------------
# Kernel 2: contrastive scores (q @ p^T * 1/t) + per-row online log-sum-exp
#   grid: (Bq tiles "parallel", Bp tiles "arbitrary"); flash-style LSE in VMEM
#   scratch; padding mask only on the final Bp tile; scores stored bf16.
# ----------------------------------------------------------------------------
def score_lse_kernel(q_ref, pT_ref, scores_ref, lse_ref, m_sc, l_sc, *,
                     scale, n_valid_p, mask_last):
    j = pl.program_id(1)
    last = pl.num_programs(1) - 1

    @pl.when(j == 0)
    def _():
        m_sc[...] = jnp.full_like(m_sc, -jnp.inf)
        l_sc[...] = jnp.zeros_like(l_sc)

    # p is pre-transposed to (D, tp): MXU consumes it directly, no XLU transpose.
    s = jnp.dot(q_ref[...], pT_ref[...],
                preferred_element_type=jnp.float32) * scale      # (tq, tp) f32
    scores_ref[...] = s.astype(scores_ref.dtype)

    def update(vals):
        m_prev = m_sc[...]
        m_new = jnp.maximum(m_prev, jnp.max(vals, axis=-1, keepdims=True))
        l_sc[...] = (l_sc[...] * jnp.exp(m_prev - m_new)
                     + jnp.sum(jnp.exp(vals - m_new), axis=-1, keepdims=True))
        m_sc[...] = m_new

    if mask_last:
        # Fast path for all full tiles; iota/compare/select only on the last one.
        @pl.when(j < last)
        def _():
            update(s)

        @pl.when(j == last)
        def _():
            tq, tp = s.shape
            col = jax.lax.broadcasted_iota(jnp.int32, (tq, tp), 1) + j * tp
            update(jnp.where(col < n_valid_p, s, -1e30))
    else:
        update(s)

    @pl.when(j == last)
    def _():
        lse_ref[...] = m_sc[...] + jnp.log(l_sc[...])


def _pick_score_tiles(Bq, Bp, D, tq, tp, scores_itemsize, budget_bytes):
    # tq multiple of 16 (bf16 operands/output), >= 2 tiles on the parallel axis.
    tq = max(16, (min(int(tq), _round_up(pl.cdiv(Bq, 2), 16),
                      _round_up(Bq, 16)) // 16) * 16)
    tp = max(128, (min(int(tp), _round_up(Bp, 128)) // 128) * 128)

    def working_set(a, b):
        return (2 * a * D * 2            # q tile (bf16), double-buffered
                + 2 * D * b * 2          # p^T tile (bf16), double-buffered
                + 2 * a * b * scores_itemsize   # scores tile, double-buffered
                + 4 * a * 4 + (2 << 20)) # scratch/LSE + slack

    while working_set(tq, tp) > budget_bytes and tp > 128:
        tp = max(128, ((tp // 2) // 128) * 128)
    while working_set(tq, tp) > budget_bytes and tq > 16:
        tq = max(16, ((tq // 2) // 16) * 16)
    return tq, tp


def scores_and_lse(q_reps, p_reps, *, scale, tq=256, tp=2048,
                   scores_dtype=jnp.bfloat16,
                   vmem_limit_bytes=48 * 1024 * 1024):
    """q_reps: (Bq, D) bf16, p_reps: (Bp, D) bf16.
    Returns (scores (Bq, Bp) scores_dtype, per-row logsumexp (Bq,) f32)."""
    Bq, D = q_reps.shape
    Bp, D2 = p_reps.shape
    assert D == D2
    tq, tp = _pick_score_tiles(Bq, Bp, D, tq, tp,
                               jnp.dtype(scores_dtype).itemsize, vmem_limit_bytes)
    Bq_pad = _round_up(Bq, tq)
    Bp_pad = _round_up(Bp, tp)

    q = q_reps
    if Bq_pad != Bq:
        q = jnp.pad(q, ((0, Bq_pad - Bq), (0, 0)))
    # TODO(synk): the (D, Bp) transpose could be emitted by the encode kernel
    # (XLU transpose of each (tile_b, D) tile); kept as a small XLA pass here.
    pT = p_reps.T                                   # (D, Bp): transpose once, outside
    if Bp_pad != Bp:
        pT = jnp.pad(pT, ((0, 0), (0, Bp_pad - Bp)))

    grid = (Bq_pad // tq, Bp_pad // tp)
    kernel = functools.partial(score_lse_kernel, scale=float(scale),
                               n_valid_p=int(Bp), mask_last=(Bp_pad != Bp))
    scores_pad, lse_pad = pl.pallas_call(
        kernel,
        out_shape=(jax.ShapeDtypeStruct((Bq_pad, Bp_pad), scores_dtype),
                   jax.ShapeDtypeStruct((Bq_pad, 1), jnp.float32)),
        grid=grid,
        in_specs=[pl.BlockSpec((tq, D), lambda i, j: (i, 0)),
                  pl.BlockSpec((D, tp), lambda i, j: (0, j))],
        out_specs=(pl.BlockSpec((tq, tp), lambda i, j: (i, j)),
                   pl.BlockSpec((tq, 1), lambda i, j: (i, 0))),
        scratch_shapes=[pltpu.VMEM((tq, 1), jnp.float32),   # running max
                        pltpu.VMEM((tq, 1), jnp.float32)],  # running sum-exp
        compiler_params=pltpu.CompilerParams(
            dimension_semantics=("parallel", "arbitrary"),
            vmem_limit_bytes=vmem_limit_bytes),
    )(q, pT)
    return scores_pad[:Bq, :Bp], lse_pad[:Bq, 0]


# ----------------------------------------------------------------------------
# BiencoderModel.forward (Pallas)
# ----------------------------------------------------------------------------
def biencoder_forward(q_task_reprs, p_task_reprs, params, args, *,
                      encode_tile_b=None, score_tq=256, score_tp=2048,
                      scores_dtype=jnp.bfloat16,
                      vmem_limit_bytes=48 * 1024 * 1024):
    """Returns dict mirroring BiencoderOutput (loss, q_reps, p_reps, labels, scores)."""
    Bq, T, H = q_task_reprs.shape
    Bp = p_task_reprs.shape[0]
    n_passages = int(args["train_n_passages"])
    world_size = int(args["world_size"])
    # This implementation covers the single-process configuration only.
    assert world_size == 1 and int(args["process_index"]) == 0
    # invariant asserted in the module's _compute_scores (guards label indexing)
    assert Bp == world_size * Bq * n_passages

    # --- Parameter prep (done once): bf16 pooler W, D padded to a lane multiple.
    # Padded D columns are zero in W and b, so the L2 norm and every dot product
    # are unchanged; reps are sliced back to D only for the returned outputs.
    D = params["pooler_w"].shape[1]
    D_pad = _round_up(D, 128)
    pool_w = params["pooler_w"].astype(jnp.bfloat16)
    pool_b = params["pooler_b"].reshape(1, -1).astype(jnp.float32)
    if D_pad != D:
        pool_w = jnp.pad(pool_w, ((0, 0), (0, D_pad - D)))
        pool_b = jnp.pad(pool_b, ((0, 0), (0, D_pad - D)))
    # softmax(weight) computed once outside the kernels, lives in SMEM.
    w_soft = jax.nn.softmax(params["weight"].astype(jnp.float32)).reshape(1, T)

    # (B, T, H) f32 -> (T, B, H) bf16: one fused cast+transpose pass per tensor,
    # no concat over the combined slab.  TODO(synk): in the full model the
    # upstream M2DPR encoder should emit task_reprs as (T, B, H) bf16 directly
    # so this relayout disappears entirely.
    q_tbh = jnp.transpose(q_task_reprs, (1, 0, 2)).astype(jnp.bfloat16)
    p_tbh = jnp.transpose(p_task_reprs, (1, 0, 2)).astype(jnp.bfloat16)

    q_reps = encode(q_tbh, w_soft, pool_w, pool_b, tile_b=encode_tile_b,
                    vmem_limit_bytes=vmem_limit_bytes)
    p_reps = encode(p_tbh, w_soft, pool_w, pool_b, tile_b=encode_tile_b,
                    vmem_limit_bytes=vmem_limit_bytes)

    # world_size == 1: dist_gather_tensor is identity, all_scores == scores.
    scale = 1.0 / float(args["t"])                  # l2_normalize=True, t_warmup=False
    loss_scale = (float(world_size) if args["loss_scale"] <= 0
                  else float(args["loss_scale"]))

    scores, lse = scores_and_lse(q_reps, p_reps, scale=scale,
                                 tq=score_tq, tp=score_tp,
                                 scores_dtype=scores_dtype,
                                 vmem_limit_bytes=vmem_limit_bytes)

    # label column for query row r is r * n_passages (world_size==1, rank 0).
    labels = jnp.arange(Bq, dtype=jnp.int32) * n_passages
    # Label scores recomputed in f32 from the bf16 reps (tiny gather + dot);
    # avoids reading bf16-quantized values out of the stored scores.
    p_lab = jnp.take(p_reps, labels, axis=0).astype(jnp.float32)
    label_scores = jnp.sum(q_reps.astype(jnp.float32) * p_lab, axis=-1) * scale
    nll = lse - label_scores                        # per-row cross-entropy NLL
    loss = jnp.mean(nll) * loss_scale               # tiny scalar epilogue

    total_n_psg = world_size * Bq * n_passages
    # TODO(synk): do_kd_biencoder path (KLDivLoss on gathered group scores) not
    # implemented — this models the non-KD contrastive configuration.
    return {
        "loss": loss,
        "q_reps": q_reps[:, :D],
        "p_reps": p_reps[:, :D],
        "labels": labels,
        "scores": scores[:, :total_n_psg],
    }


# ----------------------------------------------------------------------------
# Pure-JAX reference (mirrors the kernel's bf16 task slab / bf16 MXU operands)
# ----------------------------------------------------------------------------
def reference_forward(q_task, p_task, params, args):
    def enc(t):
        w = jax.nn.softmax(params["weight"])
        t16 = t.astype(jnp.bfloat16).astype(jnp.float32)   # kernel consumes bf16 tasks
        c = jnp.einsum("t,bth->bh", w, t16)
        pooled = jnp.dot(c.astype(jnp.bfloat16),
                         params["pooler_w"].astype(jnp.bfloat16),
                         preferred_element_type=jnp.float32) + params["pooler_b"]
        inv = jax.lax.rsqrt(jnp.maximum(
            jnp.sum(pooled * pooled, axis=-1, keepdims=True), 1e-24))
        return (pooled * inv).astype(jnp.bfloat16)

    q, p = enc(q_task), enc(p_task)
    scores = jnp.dot(q.astype(jnp.float32),
                     p.astype(jnp.float32).T) * (1.0 / args["t"])
    labels = jnp.arange(q.shape[0]) * args["train_n_passages"]
    logp = jax.nn.log_softmax(scores, axis=-1)
    loss = -jnp.mean(logp[jnp.arange(q.shape[0]), labels])
    loss = loss * (float(args["world_size"]) if args["loss_scale"] <= 0
                   else args["loss_scale"])
    return scores, loss, q, p


if __name__ == "__main__":
    # Small but lane-dense shapes chosen so every grid has >1 step and the
    # padding paths are exercised:
    #   Bq=24 -> 2 query tiles of 16 (8 padded rows sliced off)
    #   Bp=192 -> 2 passage tiles of 128 (masked last tile)
    #   D=96  -> padded once to 128 at parameter-prep time
    Bq, T, H, D = 24, 4, 128, 96
    n_passages = 8
    Bp = Bq * n_passages
    args = dict(world_size=1, process_index=0, train_n_passages=n_passages,
                t=0.05, loss_scale=-1.0)

    key = jax.random.PRNGKey(0)
    k1, k2, k3 = jax.random.split(key, 3)
    q_task = jax.random.normal(k1, (Bq, T, H), jnp.float32)
    p_task = jax.random.normal(k2, (Bp, T, H), jnp.float32)
    params = {
        # nn.Parameter(torch.Tensor([1.0] * total_task_nums))
        "weight": jnp.ones((T,), jnp.float32),
        # pooler = nn.Linear(hidden_size, out_dimension), stored as (H, D)
        "pooler_w": 0.02 * jax.random.normal(k3, (H, D), jnp.float32),
        "pooler_b": jnp.zeros((D,), jnp.float32),
    }

    # small tile caps so the encode grid (2 / 12 steps) and the score grid
    # (2x2: parallel Bq x online-LSE Bp sweep with a masked last tile) are
    # actually exercised.
    out = biencoder_forward(q_task, p_task, params, args,
                            encode_tile_b=16, score_tq=16, score_tp=128)
    jax.block_until_ready(out)

    ref_scores, ref_loss, ref_q, ref_p = reference_forward(q_task, p_task, params, args)
    scores_f32 = out["scores"].astype(jnp.float32)
    assert scores_f32.shape == (Bq, Bp)
    # scores are stored bf16 (|s| <= 1/t = 20 -> quantization <= ~0.04)
    assert jnp.allclose(scores_f32, ref_scores, atol=1.5e-1, rtol=0.0)
    assert jnp.allclose(out["q_reps"].astype(jnp.float32),
                        ref_q.astype(jnp.float32), atol=2e-2, rtol=2e-2)
    assert jnp.allclose(out["p_reps"].astype(jnp.float32),
                        ref_p.astype(jnp.float32), atol=2e-2, rtol=2e-2)
    assert jnp.allclose(out["loss"], ref_loss, atol=2e-2, rtol=1e-3)
    assert bool(jnp.all(out["labels"] == jnp.arange(Bq) * n_passages))

    print("KERNEL_OK")
</pallas_src>

<mosaic_0001>
module attributes {stable_mosaic.version = 11 : i64} {
  func.func @encode_kernel(%arg0: i32, %arg1: memref<1x4xf32, #tpu.memory_space<smem>>, %arg2: memref<4x16x128xbf16, #tpu.memory_space<vmem>>, %arg3: memref<128x128xbf16, #tpu.memory_space<vmem>>, %arg4: memref<1x128xf32, #tpu.memory_space<vmem>>, %arg5: memref<16x128xbf16, #tpu.memory_space<vmem>>) attributes {dimension_semantics = [#tpu.dimension_semantics<parallel>], iteration_bounds = array<i64: 2>, scalar_prefetch = 0 : i64, scratch_operands = 0 : i64, tpu.core_type = #tpu.core_type<tc>, window_params = [{transform_indices = @transform_0, window_bounds = array<i64: 1, 4>}, {transform_indices = @transform_1, window_bounds = array<i64: 4, 16, 128>}, {pipeline_mode = #tpu.pipeline_mode<synchronous>, transform_indices = @transform_2, window_bounds = array<i64: 128, 128>}, {pipeline_mode = #tpu.pipeline_mode<synchronous>, transform_indices = @transform_3, window_bounds = array<i64: 1, 128>}, {transform_indices = @transform_4, window_bounds = array<i64: 16, 128>}]} {
    %c0 = arith.constant 0 : index
    %c0_0 = arith.constant 0 : index
    %0 = memref.load %arg1[%c0, %c0_0] : memref<1x4xf32, #tpu.memory_space<smem>>
    %c0_1 = arith.constant 0 : index
    %c0_2 = arith.constant 0 : index
    %c0_3 = arith.constant 0 : index
    %1 = vector.load %arg2[%c0_1, %c0_2, %c0_3] : memref<4x16x128xbf16, #tpu.memory_space<vmem>>, vector<1x16x128xbf16>
    %2 = vector.shape_cast %1 : vector<1x16x128xbf16> to vector<16x128xbf16>
    %3 = arith.extf %2 : vector<16x128xbf16> to vector<16x128xf32>
    %4 = vector.broadcast %0 : f32 to vector<16x128xf32>
    %5 = arith.mulf %4, %3 : vector<16x128xf32>
    %c0_4 = arith.constant 0 : index
    %c1 = arith.constant 1 : index
    %6 = memref.load %arg1[%c0_4, %c1] : memref<1x4xf32, #tpu.memory_space<smem>>
    %c1_5 = arith.constant 1 : index
    %c0_6 = arith.constant 0 : index
    %c0_7 = arith.constant 0 : index
    %7 = vector.load %arg2[%c1_5, %c0_6, %c0_7] : memref<4x16x128xbf16, #tpu.memory_space<vmem>>, vector<1x16x128xbf16>
    %8 = vector.shape_cast %7 : vector<1x16x128xbf16> to vector<16x128xbf16>
    %9 = arith.extf %8 : vector<16x128xbf16> to vector<16x128xf32>
    %10 = vector.broadcast %6 : f32 to vector<16x128xf32>
    %11 = arith.mulf %10, %9 : vector<16x128xf32>
    %12 = arith.addf %5, %11 : vector<16x128xf32>
    %c0_8 = arith.constant 0 : index
    %c2 = arith.constant 2 : index
    %13 = memref.load %arg1[%c0_8, %c2] : memref<1x4xf32, #tpu.memory_space<smem>>
    %c2_9 = arith.constant 2 : index
    %c0_10 = arith.constant 0 : index
    %c0_11 = arith.constant 0 : index
    %14 = vector.load %arg2[%c2_9, %c0_10, %c0_11] : memref<4x16x128xbf16, #tpu.memory_space<vmem>>, vector<1x16x128xbf16>
    %15 = vector.shape_cast %14 : vector<1x16x128xbf16> to vector<16x128xbf16>
    %16 = arith.extf %15 : vector<16x128xbf16> to vector<16x128xf32>
    %17 = vector.broadcast %13 : f32 to vector<16x128xf32>
    %18 = arith.mulf %17, %16 : vector<16x128xf32>
    %19 = arith.addf %12, %18 : vector<16x128xf32>
    %c0_12 = arith.constant 0 : index
    %c3 = arith.constant 3 : index
    %20 = memref.load %arg1[%c0_12, %c3] : memref<1x4xf32, #tpu.memory_space<smem>>
    %c3_13 = arith.constant 3 : index
    %c0_14 = arith.constant 0 : index
    %c0_15 = arith.constant 0 : index
    %21 = vector.load %arg2[%c3_13, %c0_14, %c0_15] : memref<4x16x128xbf16, #tpu.memory_space<vmem>>, vector<1x16x128xbf16>
    %22 = vector.shape_cast %21 : vector<1x16x128xbf16> to vector<16x128xbf16>
    %23 = arith.extf %22 : vector<16x128xbf16> to vector<16x128xf32>
    %24 = vector.broadcast %20 : f32 to vector<16x128xf32>
    %25 = arith.mulf %24, %23 : vector<16x128xf32>
    %26 = arith.addf %19, %25 : vector<16x128xf32>
    %27 = arith.truncf %26 : vector<16x128xf32> to vector<16x128xbf16>
    %c0_16 = arith.constant 0 : index
    %c0_17 = arith.constant 0 : index
    %28 = vector.load %arg3[%c0_16, %c0_17] : memref<128x128xbf16, #tpu.memory_space<vmem>>, vector<128x128xbf16>
    %cst = arith.constant dense<0.000000e+00> : vector<16x128xf32>
    %29 = tpu.matmul %27, %28, %cst {dimension_numbers = #tpu.dot_dimension_numbers<[1], [0], [0], [1], [0, 0, 1, 1], [], []>} : vector<16x128xbf16>, vector<128x128xbf16>, vector<16x128xf32> -> vector<16x128xf32>
    %c0_18 = arith.constant 0 : index
    %c0_19 = arith.constant 0 : index
    %30 = vector.load %arg4[%c0_18, %c0_19] : memref<1x128xf32, #tpu.memory_space<vmem>>, vector<1x128xf32>
    %31 = vector.broadcast %30 : vector<1x128xf32> to vector<16x128xf32>
    %32 = arith.addf %29, %31 : vector<16x128xf32>
    %33 = arith.mulf %32, %32 : vector<16x128xf32>
    %cst_20 = arith.constant dense<0.000000e+00> : vector<16xf32>
    %34 = vector.multi_reduction <add>, %33, %cst_20 [1] : vector<16x128xf32> to vector<16xf32>
    %35 = vector.shape_cast %34 : vector<16xf32> to vector<16x1xf32>
    %cst_21 = arith.constant 1.000000e-24 : f32
    %36 = vector.broadcast %cst_21 : f32 to vector<16x1xf32>
    %37 = arith.maximumf %35, %36 : vector<16x1xf32>
    %38 = math.rsqrt %37 : vector<16x1xf32>
    %39 = vector.broadcast %38 : vector<16x1xf32> to vector<16x128xf32>
    %40 = arith.mulf %32, %39 : vector<16x128xf32>
    %41 = arith.truncf %40 : vector<16x128xf32> to vector<16x128xbf16>
    %c0_22 = arith.constant 0 : index
    %c0_23 = arith.constant 0 : index
    %42 = vector.load %arg5[%c0_22, %c0_23] : memref<16x128xbf16, #tpu.memory_space<vmem>>, vector<16x128xbf16>
    tpu.vector_store %arg5[%c0_22, %c0_23], %41 {strides = array<i32>} : memref<16x128xbf16, #tpu.memory_space<vmem>>, vector<16x128xbf16>,
    return
  }
  func.func @transform_0(%arg0: i32) -> (i32, i32) {
    %c0_i32 = arith.constant 0 : i32
    %c0_i32_0 = arith.constant 0 : i32
    %c0_i32_1 = arith.constant 0 : i32
    return %c0_i32, %c0_i32_0 : i32, i32
  }
  func.func @transform_1(%arg0: i32) -> (i32, i32, i32) {
    %c0_i32 = arith.constant 0 : i32
    %c0_i32_0 = arith.constant 0 : i32
    %c0_i32_1 = arith.constant 0 : i32
    return %c0_i32, %arg0, %c0_i32_0 : i32, i32, i32
  }
  func.func @transform_2(%arg0: i32) -> (i32, i32) {
    %c0_i32 = arith.constant 0 : i32
    %c0_i32_0 = arith.constant 0 : i32
    %c0_i32_1 = arith.constant 0 : i32
    return %c0_i32, %c0_i32_0 : i32, i32
  }
  func.func @transform_3(%arg0: i32) -> (i32, i32) {
    %c0_i32 = arith.constant 0 : i32
    %c0_i32_0 = arith.constant 0 : i32
    %c0_i32_1 = arith.constant 0 : i32
    return %c0_i32, %c0_i32_0 : i32, i32
  }
  func.func @transform_4(%arg0: i32) -> (i32, i32) {
    %c0_i32 = arith.constant 0 : i32
    %c0_i32_0 = arith.constant 0 : i32
    return %arg0, %c0_i32 : i32, i32
  }
}

</mosaic_0001>

<bundles_post_ra>
// kernel: tpu_custom_call.1
= control target key start
LH: loop header
LB: loop body
LE: loop exit
PB: predicated region body
PF: predicated region fallthrough
CT: control target
= control target key end

     0   :  { %9 = vsyncpa [#allocation5], 0  ;;  %s1083_s0 = inlined_call_operand.hbm [shape: f32[1,4], index: 0, kind: input, shape index: {}]   ;;  %s1084_s1 = inlined_call_operand.hbm [shape: bf16[4,32,128], index: 1, kind: input, shape index: {}]   ;;  %s1085_s2 = inlined_call_operand.hbm [shape: bf16[128,128], index: 2, kind: input, shape index: {}]   ;;  %s1086_s3 = inlined_call_operand.vmem [shape: f32[1,128], index: 3, kind: input, shape index: {}]   ;;  %s1087_s4 = inlined_call_operand.hbm [shape: bf16[32,128], index: 4, kind: output, shape index: {}]  }
   0x1   :  { %10 = vsyncpa [#allocation3], 0 }
   0x2   :  { %12 = vsyncpa [#allocation3 + $0x1], 0 }
   0x3   :  { %13 = vsyncpa [#allocation8], 0 }
   0x4   :  { %14 = vsyncpa [#allocation4], 0 }
   0x5   :  { %16 = vsyncpa [#allocation4 + $0x1], 0  ;;  %s897_s15 = smov 0   ;;  %s899_s16 = smov 0  }
   0x6   :  { %s901_s17 = smov 0   ;;  %s903_s18 = smov 0  }
   0x7 LB: > { %s918_s19 = sadd.s32 4294967295, %s855_s18   ;;  %s556_s20 = sadd.s32 4294967294, %s855_s18   ;;  %s855_s18 = sphi %s903_s18, %s1103_s18   ;;  %s851_s17 = sphi %s901_s17, %s1102_s17   ;;  %s847_s16 = sphi %s899_s16, %s1101_s16   ;;  %s843_s15 = sphi %s897_s15, %s1100_s15  }
   0x8   : > { %s922_s21 = sadd.s32 1, %s855_s18   ;;  %s50_s22 = sadd.s32 1, %s851_s17 }
   0x9   : > { %s47_s23 = ssub.s32 %s855_s18, %s922_s21  ;;  %p57_p0 = scmp.ne.s32.totalorder %s851_s17, %s847_s16 }
   0xa   : > { %p48_p1 = scmp.eq.s32.totalorder %s47_s23, 0  ;;  %p58_p2 = scmp.eq.s32.totalorder %s855_s18, 0 }
   0xb   : > { %p63_p3 = scmp.ne.s32.totalorder %s847_s16, %s843_s15  ;;  %p1088_p4 = scmp.eq.s32.totalorder %s918_s19, 0 }
   0xc   : > { %s934_s24 = scalar_select %p48_p1, %s851_s17, %s50_s22  }
   0xd   : > { %p936_p5 = por %p58_p2, %p57_p0  ;;  %p942_p6 = por %p1088_p4, %p63_p3 }
   0xe   : > { %p129_p7 = scmp.eq.s32.totalorder %s918_s19, 1  ;;  %p135_p8 = scmp.eq.s32.totalorder %s556_s20, 1 }
   0xf   : > { %p557_p9 = scmp.ge.s32.totalorder %s855_s18, 1  ;;  %p142_p10 = scmp.lt.s32.totalorder %s855_s18, 3 }
  0x10   : > { %p949_p11 = por %p129_p7, %p57_p0  ;;  %p953_p12 = por %p135_p8, %p63_p3 }
  0x11   : > { %p957_p13 = pnand %p557_p9, %p142_p10  ;;  %s857_s30 = smov [#allocation7]  }
  0x12   : > { %s1092_s28 = scalar_select %p953_p12, 1, 0 }
  0x13   : > { %p672_p1 = pneg %p957_p13  ;;  %s163_s5 = sshll.u32 %s857_s30, 4  ;;  %s164_s5 = int_to_ptr.vmem [resolvable:$true] %s163_s5 }
  0x14   : > { %s858_s7 = smov [#allocation2]   ;;  %s768_s10 = scalar_lea.vmem %s164_s5, 1024 }
  0x15   : > { %p965_p2 = pnand %p672_p1, %p1088_p4  ;;  %p769_p3 = scmp.ne.s32.totalorder %s164_s5, %s768_s10 }
  0x16   : > { %p776_p9 = scmp.lt.s32.totalorder %s164_s5, %s164_s5  ;;  %p777_p10 = scmp.lt.s32.totalorder %s768_s10, %s768_s10 }
  0x17   : > { %675 = dma.hbm_to_smem (!%p965_p2), %s1083_s0, 16, %s858_s7, [#allocation5]  }
  0x18   : > { %p759_p0 = pneg %p965_p2  ;;  %p778_p1 = por %p777_p10, %p776_p9 }
  0x1a   : > { %p771_p7 = pnand %p769_p3, %p759_p0 }
  0x1c   : > { %p772_p8 = pneg %p771_p7 }
  0x1e   : > { %p779_p4 = pnand %p778_p1, %p772_p8 }
  0x20   : > { %782 = shalt.err (!%p779_p4)
}
  0x21   : > { %s859_s11 = smov 64   ;;  %s860_s12 = smov 4  }
  0x22   : > { %678 = dma.hbm_to_vmem [thread:$0]  (!%p965_p2), %s1085_s2, 1024, %s164_s5, [#allocation8], %s859_s11, %s859_s11, %s860_s12  }
  0x23   : > { %p560_p12 = scmp.ge.s32.totalorder %s855_s18, 2 }
  0x25   : > { %176 = sbr.rel (%p560_p12) target bundleno = 55 (0x37), region = 28 }
  0x2a   : > { %s180_s20 = sand.u32 1, %s851_s17   ;;  %s596_s22 = sshll.u32 %s855_s18, 7 }
  0x2b   : > { %s561_s23 = sshll.u32 %s180_s20, 5  ;;  %s190_s5 = scalar_lea.hbm %s1084_s1, %s596_s22 }
  0x2c   : > { %s657_s7 = scalar_select %p936_p5, [#allocation0], [#allocation12] }
  0x2d   : > { %s184_s8 = scalar_lea.vmem [#allocation6], %s561_s23  ;;  %s861_s11 = smov 256  }
  0x2e   : > { %s203_s9 = sshll.u32 %s184_s8, 4  ;;  %s195_s10 = sld [smem:[%s657_s7]]   ;;  %s204_s9 = int_to_ptr.vmem [resolvable:$true] %s203_s9 }
  0x2f   : > { %658 = sst [smem:[#allocation11]] (%p936_p5), %s861_s11  ;;  %s862_s12 = smov 128  }
  0x30   : > { %659 = sst [smem:[#allocation11 + $0x1]] (%p936_p5), %s862_s12  ;;  %s863_s13 = smov 2  }
  0x31   : > { %660 = sst [smem:[#allocation11 + $0x2]] (%p936_p5), %s863_s13  ;;  %s864_s14 = smov 64  }
  0x32   : > { %661 = sst [smem:[#allocation11 + $0x3]] (%p936_p5), %s864_s14  ;;  %s865_s23 = smov 4  }
  0x33   : > { %662 = sst [smem:[#allocation11 + $0x4]] (%p936_p5), %s864_s14  ;;  %s181_s6 = scalar_lea.sflag [#allocation3], %s180_s20 }
  0x34   : > { %s564_s22 = sshll.u32 %s195_s10, 26  ;;  %663 = sst [smem:[#allocation11 + $0x5]] (%p936_p5), %s865_s23 }
  0x35   : > { %s565_s30 = sadd.s32 134217728, %s564_s22  ;;  %s866_s7 = smov 131072  }
  0x36   : > { %664 = dma.general (%p936_p5), %s190_s5, 512, %s204_s9, %s181_s6, %s866_s7, [#allocation11], %s565_s30, 0  }
  0x37 PF: > { %228 = sbr.rel (%p957_p13) target bundleno = 476 (0x1dc), region = 36  ;;  %p1095_p4 = scmp.eq.s32.totalorder (!%p957_p13), %s918_s19, 0 }
  0x3c   : > { %826 = dma.done.wait (%p1095_p4), [#allocation5], 16   ;;  %p1096_p2 = pmov %p1095_p4 }
  0x3d   : > { %s1012_s8 = sand.u32 1, %s847_s16  }
  0x3e   : > { %828 = vsyncadd (%p1096_p2), [#allocation5], 4294967280  ;;  %s568_s20 = sshll.u32 %s1012_s8, 5  ;;  %s235_s10 = scalar_lea.sflag [#allocation3], %s1012_s8 }
  0x3f   : > { %s1016_s25 = scalar_lea.vmem [#allocation6], %s568_s20 }
  0x40   : > { %830 = dma.done.wait (%p942_p6), %s235_s10, 512  }
  0x41   : > { %832 = vsyncadd (%p942_p6), %s235_s10, 4294966784  ;;  %p1097_p5 = pmov %p1096_p2 }
  0x42   : > { %p1098_p13 = pmov %p1096_p2 }
  0x43   : > { %834 = dma.done.wait (%p1097_p5), [#allocation8], 1024  }
  0x44   : > { %836 = vsyncadd (%p1098_p13), [#allocation8], 4294966272 }
  0x45   : > { %247 = sfence }
  0x46   : > { %v734_v0 = vld [vmem:[#allocation7 + $0x38] sm:$0xff]   ;;  %v867_v1 = vmov 0.0   ;;  %v735_v2 = vld [vmem:[#allocation7 + $0x30] sm:$0xff]   ;;  %vm868_vm0 = vmmov 0   ;;  %v736_v3 = vld [vmem:[#allocation7 + $0x28] sm:$0xff]   ;;  %s271_s26 = sld [smem:[#allocation2]] }
  0x47   : > { %633 = vmatprep.subr.bf16.mxu0 %v867_v1  ;;  %649 = vmatprep.mubr.msk.bf16.mxu0 %vm868_vm0, %v867_v1  ;;  %v601_v4 = vld [vmem:[%s1016_s25] sm:$0xff]   ;;  %s571_s29 = sld [smem:[#allocation2 + $0x1]]  ;;  %v621_v5 = vld [vmem:[%s1016_s25 + $0x8] sm:$0xff]   ;;  %v622_v7 = vld [vmem:[%s1016_s25 + $0x10] sm:$0xff]   ;;  %s570_s13 = sshll.u32 %s1012_s8, 3 }
  0x48   : > { %634 = vmatpush3.bf16.msra.mxu0 %v734_v0  ;;  %v737_v6 = vld [vmem:[#allocation7 + $0x20] sm:$0xff]   ;;  %s574_s5 = sld [smem:[#allocation2 + $0x2]]  ;;  %v602_v8 = vunpack.c.l.bf16 %v601_v4  ;;  %v603_v9 = vunpack.c.h.bf16 %v601_v4  ;;  %v606_v10 = vunpack.c.l.bf16 %v621_v5  ;;  %v607_v11 = vunpack.c.h.bf16 %v621_v5  ;;  %v738_v14 = vld [vmem:[#allocation7 + $0x18] sm:$0xff]   ;;  %v739_v27 = vld [vmem:[#allocation7 + $0x10] sm:$0xff]   ;;  %s599_s14 = sshll.u32 %s918_s19, 7 }
  0x49   : > { %635 = vmatprep.subr.bf16.mxu0 %v867_v1  ;;  %s577_s9 = sld [smem:[#allocation2 + $0x3]]  ;;  %v610_v12 = vunpack.c.l.bf16 %v622_v7  ;;  %v611_v13 = vunpack.c.h.bf16 %v622_v7  ;;  %v623_v16 = vld [vmem:[%s1016_s25 + $0x18] sm:$0xff]   ;;  %v740_v35 = vld [vmem:[#allocation7 + $0x8] sm:$0xff]   ;;  %v741_v38 = vld [vmem:[#allocation7] sm:$0xff]   ;;  %s267_s22 = scalar_lea.vmem [#allocation9], %s570_s13 }
  0x4a   : > { %v614_v25 = vunpack.c.l.bf16 %v623_v16  ;;  %v615_v26 = vunpack.c.h.bf16 %v623_v16  ;;  %v580_v40 = vld [vmem:[%s1086_s3] ss:$0 sm:$0xff]  ;;  %s461_s23 = sshll.u32 %s267_s22, 4  ;;  %s1038_s7 = scalar_lea.hbm %s1087_s4, %s599_s14  ;;  %s1040_s23 = int_to_ptr.vmem [resolvable:$true] %s461_s23 }
  0x4b   : > { %s448_s20 = scalar_lea.sflag [#allocation4], %s1012_s8  ;;  %s783_s10 = scalar_lea.vmem %s1040_s23, 128 }
  0x4c   : > { %636 = vmatpush3.bf16.msra.mxu0 %v735_v2  ;;  %v276_v15 = vstv %s271_s26  ;;  %p784_p6 = scmp.ne.s32.totalorder %s1040_s23, %s783_s10  ;;  %s869_s19 = smov [#allocation9]  }
  0x4d   : > { %637 = vmatprep.subr.bf16.mxu0 %v867_v1  ;;  %v277_v17 = vmul.f32 %v602_v8, %v276_v15  ;;  %v278_v18 = vmul.f32 %v603_v9, %v276_v15  ;;  %v285_v19 = vstv %s571_s29  ;;  %s787_s25 = sshll.u32 %s869_s19, 4  ;;  %s788_s25 = int_to_ptr.vmem [resolvable:$false] %s787_s25 }
  0x4e   : > { %v286_v20 = vmul.f32 %v606_v10, %v285_v19  ;;  %v287_v21 = vmul.f32 %v607_v11, %v285_v19  ;;  %v296_v22 = vstv %s574_s5  ;;  %p785_p0 = pnand %p784_p6, %p949_p11  ;;  %s789_s26 = scalar_lea.vmem %s788_s25, 256 }
  0x4f   : > { %v297_v23 = vmul.f32 %v610_v12, %v296_v22  ;;  %v298_v24 = vmul.f32 %v611_v13, %v296_v22  ;;  %v307_v30 = vstv %s577_s9  ;;  %p790_p7 = scmp.lt.s32.totalorder %s1040_s23, %s788_s25  ;;  %p791_p8 = scmp.lt.s32.totalorder %s789_s26, %s783_s10 }
  0x50   : > { %638 = vmatpush3.bf16.msra.mxu0 %v736_v3  ;;  %v288_v28 = vadd.f32 %v286_v20, %v277_v17  ;;  %v289_v29 = vadd.f32 %v287_v21, %v278_v18  ;;  %v308_v33 = vmul.f32 %v614_v25, %v307_v30  ;;  %v309_v34 = vmul.f32 %v615_v26, %v307_v30  ;;  %p786_p3 = pneg %p785_p0 }
  0x51   : > { %639 = vmatprep.subr.bf16.mxu0 %v867_v1  ;;  %p792_p9 = por %p791_p8, %p790_p7 }
  0x52   : > { %v299_v31 = vadd.f32 %v297_v23, %v288_v28  ;;  %v300_v32 = vadd.f32 %v298_v24, %v289_v29 }
  0x53   : > { %p793_p10 = pnand %p792_p9, %p786_p3 }
  0x54   : > { %640 = vmatpush3.bf16.msra.mxu0 %v737_v6  ;;  %v310_v36 = vadd.f32 %v308_v33, %v299_v31  ;;  %v311_v37 = vadd.f32 %v309_v34, %v300_v32 }
  0x55   : > { %641 = vmatprep.subr.bf16.mxu0 %v867_v1 }
  0x56   : > { %v312_v39 = vpack.c.bf16 %v311_v37, %v310_v36 }
  0x58   : > { %642 = vmatpush3.bf16.msra.mxu0 %v738_v14 }
  0x59   : > { %643 = vmatprep.subr.bf16.mxu0 %v867_v1 }
  0x5c   : > { %644 = vmatpush3.bf16.msra.mxu0 %v739_v27 }
  0x5d   : > { %645 = vmatprep.subr.bf16.mxu0 %v867_v1 }
  0x60   : > { %646 = vmatpush3.bf16.msra.mxu0 %v740_v35 }
  0x61   : > { %647 = vmatprep.subr.bf16.mxu0 %v867_v1 }
  0x64   : > { %648 = vmatpush3.bf16.msra.mxu0 %v741_v38 }
  0x67   : > { %650 = vmatmul.mubr.bf16.vlgmr.msra.gmra.mxu0 %v312_v39 }
 0x127   : > { %v418_v41 = vpop.f32.mrf.mxu0 }
 0x128   : > { %v419_v42 = vadd.f32 %v580_v40, %v418_v41 }
 0x129   : > { %v651_v43 = vpop.f32.mrf.mxu0 }
 0x12a   : > { %v425_v44 = vmul.f32 %v419_v42, %v419_v42 }
 0x12b   : > { %v421_v45 = vpop.f32.mrf.mxu0 }
 0x12c   : > { %v422_v46 = vadd.f32 %v580_v40, %v421_v45  ;;  %427 = vadd.xlane.f32.xlu0 %v425_v44 }
 0x12d   : > { %v652_v47 = vpop.f32.mrf.mxu0 }
 0x12e   : > { %v426_v48 = vmul.f32 %v422_v46, %v422_v46 }
 0x130   : > { %429 = vadd.xlane.f32.xlu0 %v426_v48 }
 0x1b5   : > { %v428_v49 = vpop.xlane.xlu0 %427 }
 0x1b6   : > { %v431_v50 = vmax.f32 %v428_v49, 1e-24 }
 0x1b8   : > { %742 = vrsqrt.f32 %v431_v50 }
 0x1b9   : > { %v430_v51 = vpop.xlane.xlu0 %429 }
 0x1ba   : > { %v432_v52 = vmax.f32 %v430_v51, 1e-24 }
 0x1bc   : > { %744 = vrsqrt.f32 %v432_v52 }
 0x1c5   : > { %v743_v53 = vpop.eup %742 }
 0x1c6   : > { %v435_v55 = vmul.f32 %v743_v53, %v419_v42 }
 0x1c9   : > { %v745_v54 = vpop.eup %744 }
 0x1ca   : > { %v436_v56 = vmul.f32 %v745_v54, %v422_v46 }
 0x1cc   : > { %v619_v57 = vpack.c.bf16 %v436_v56, %v435_v55 }
 0x1ce   : > { %620 = vst [vmem:[%s267_s22] sm:$0xff] %v619_v57  }
 0x1cf   : > { %796 = shalt.err (!%p793_p10)
}
 0x1d0   : > { %s797_s29 = scalar_lea.hbm %s1038_s7, 128  ;;  %s801_s11 = scalar_lea.hbm %s1087_s4, 256 }
 0x1d1   : > { %p798_p1 = scmp.ne.s32.totalorder %s1038_s7, %s797_s29  ;;  %p802_p5 = scmp.lt.s32.totalorder %s1038_s7, %s1087_s4 }
 0x1d2   : > { %p803_p13 = scmp.lt.s32.totalorder %s801_s11, %s797_s29 }
 0x1d3   : > { %p799_p4 = pnand %p798_p1, %p949_p11 }
 0x1d4   : > { %p804_p6 = por %p803_p13, %p802_p5 }
 0x1d5   : > { %p800_p2 = pneg %p799_p4 }
 0x1d7   : > { %p805_p0 = pnand %p804_p6, %p800_p2 }
 0x1d9   : > { %808 = shalt.err (!%p805_p0)
}
 0x1da   : > { %s870_s14 = smov 64   ;;  %s871_s22 = smov 4  }
 0x1db   : > { %670 = dma.vmem_to_hbm [thread:$0]  (%p949_p11), %s1040_s23, 128, %s1038_s7, %s448_s20, %s870_s14, %s870_s14, %s871_s22  }
 0x1dc PF: > { %s476_s30 = sand.u32 1, %s843_s15   ;;  %p1099_p3 = scmp.ne.s32.totalorder %s1092_s28, 0 }
 0x1dd   : > { %s477_s6 = scalar_lea.sflag [#allocation4], %s476_s30 }
 0x1de   : > { %p680_p7 = pnand %p560_p12, %p1099_p3 }
 0x1e0   : > { %p681_p8 = pneg %p680_p7 }
 0x1e2   : > { %838 = dma.done.wait (%p681_p8), %s477_s6, 128  }
 0x1e3   : > { %840 = vsyncadd (%p681_p8), %s477_s6, 4294967168  ;;  %p19_p9 = scmp.ge.s32.totalorder %s922_s21, 4   ;;  %s1100_s15 = smov %s847_s16 }
 0x1e4   : > { %s1101_s16 = smov %s851_s17  ;;  %s1102_s17 = smov %s934_s24 }
 0x1e5   : > { %s1103_s18 = smov %s922_s21  ;;  %21 = sbr.rel (!%p19_p9) target bundleno = 7 (0x7), region = 98 }
 0x1ea   :  { %482 = vsyncpa [#allocation3], 1 }
 0x1eb   :  { %484 = vsyncpa [#allocation3 + $0x1], 1 }
 0x1ec   :  { %485 = vsyncpa [#allocation8], 1 }
 0x1ed   :  { %486 = vsyncpa [#allocation4], 1 }
 0x1ee   :  { %488 = vsyncpa [#allocation4 + $0x1], 1 }
 0x1ef   :  { %489 = vsyncpa [#allocation5], 1 }
 0x1f0   :  { %491 = vsyncpa [#allocation5 + $0x1], 1 }

</bundles_post_ra>
